<compile_context>
chip_gen: v7x
topology: tpu7x:2x2x1
jax: 0.10.0
libtpu: 0.0.40
codegen_flags: <defaults>
</compile_context>

<pallas_src>
import functools

import jax
import jax.numpy as jnp
from jax.experimental import pallas as pl
from jax.experimental.pallas import tpu as pltpu


def _layernorm2d_kernel(eps, inv_c, x_ref, w_ref, b_ref, o_ref):
    """x_ref/o_ref: (tile_n, C, tile_hw) blocks; w_ref / b_ref: (1, C, 1)."""
    x = x_ref[...].astype(jnp.float32)
    # One-pass statistics over the channel (sublane) axis. Every spatial
    # column / batch row is normalized independently, so padded lanes or
    # padded batch rows in partial tiles never contaminate valid outputs
    # (and padded outputs are never written back to HBM).
    s1 = jnp.sum(x, axis=1, keepdims=True)                # (tile_n, 1, tile_hw)
    s2 = jnp.sum(x * x, axis=1, keepdims=True)
    mean = s1 * inv_c
    # Clamp: E[x^2] - mean^2 can go slightly negative from cancellation.
    var = jnp.maximum(s2 * inv_c - mean * mean, 0.0)
    inv = jax.lax.rsqrt(var + eps)                        # (tile_n, 1, tile_hw)
    w = w_ref[...].astype(jnp.float32)                    # (1, C, 1)
    b = b_ref[...].astype(jnp.float32)
    # (x - mean) is recomputed here rather than kept live across a separate
    # variance pass -> fewer full-tile f32 temporaries / less vreg pressure.
    o_ref[...] = ((x - mean) * (inv * w) + b).astype(o_ref.dtype)


def _vmem_budget():
    """Generation-aware (target_tile_bytes, vmem_limit_bytes)."""
    try:
        cap = pltpu.get_tpu_info().vmem_capacity_bytes
    except Exception:
        cap = None
    if cap is not None and cap <= (64 << 20):
        # v7x: 64 MiB per TensorCore -> keep 2x(in+out) tiles + temps small.
        return 4 << 20, 40 << 20
    if cap is not None and cap >= (100 << 20):
        # v5e / v6e: 128 MiB physical VMEM -> push toward the roofline plateau.
        return 8 << 20, 96 << 20
    # Unknown generation: conservative default, safe everywhere.
    return 4 << 20, 48 << 20


def _choose_tiles(n, c, hw, itemsize, target_bytes):
    """Pick (tile_n, tile_hw): lane-dense tiles (multiple of 128 or full
    extent), blocks grown over N and HW toward target_bytes, and a grid that
    never collapses to a single block when N >= 2 (v7x has 2 TensorCores)."""
    itemsize = max(int(itemsize), 1)
    if hw <= 128:
        tile_hw = hw                                       # full extent allowed
    else:
        max_hw = max(128, target_bytes // (itemsize * max(c, 1)))
        tile_hw = min(hw, (max_hw // 128) * 128)
        tile_hw = max(128, tile_hw)
    n_hw_tiles = pl.cdiv(hw, tile_hw)

    block_bytes = max(c * tile_hw * itemsize, 1)
    tile_n = max(1, min(n, target_bytes // block_bytes))
    if n_hw_tiles == 1 and n >= 2:
        # Guarantee >= 2 blocks along a parallel axis.
        tile_n = min(tile_n, (n + 1) // 2)
    n_n_tiles = pl.cdiv(n, tile_n)
    return tile_n, tile_hw, n_n_tiles, n_hw_tiles


def layernorm2d(x_nchw, weight, bias, eps=1e-5):
    """x_nchw: (N, C, H, W); weight/bias: (C,). Returns (N, C, H, W)."""
    N, C, H, W = x_nchw.shape
    HW = H * W

    # Free reshape: NCHW -> (N, C, HW). No transposes, no extra HBM traffic.
    x3d = x_nchw.reshape(N, C, HW)
    w3d = weight.reshape(1, C, 1)
    b3d = bias.reshape(1, C, 1)

    target_bytes, vmem_limit = _vmem_budget()
    itemsize = jnp.dtype(x3d.dtype).itemsize               # actual I/O itemsize
    tile_n, tile_hw, n_n_tiles, n_hw_tiles = _choose_tiles(
        N, C, HW, itemsize, target_bytes)

    kernel = functools.partial(_layernorm2d_kernel, float(eps), 1.0 / float(C))

    cost = pl.CostEstimate(
        flops=10 * N * C * HW,
        transcendentals=N * HW,                             # rsqrt per column
        bytes_accessed=2 * N * C * HW * itemsize,
    )

    out3d = pl.pallas_call(
        kernel,
        out_shape=jax.ShapeDtypeStruct((N, C, HW), x3d.dtype),
        grid_spec=pltpu.PrefetchScalarGridSpec(
            num_scalar_prefetch=0,
            grid=(n_n_tiles, n_hw_tiles),
            in_specs=[
                pl.BlockSpec((tile_n, C, tile_hw), lambda ni, hj: (ni, 0, hj)),
                pl.BlockSpec((1, C, 1), lambda ni, hj: (0, 0, 0)),
                pl.BlockSpec((1, C, 1), lambda ni, hj: (0, 0, 0)),
            ],
            out_specs=pl.BlockSpec((tile_n, C, tile_hw),
                                   lambda ni, hj: (ni, 0, hj)),
        ),
        compiler_params=pltpu.CompilerParams(
            # Both grid axes are independent -> shard across TCs on v7x.
            dimension_semantics=("parallel", "parallel"),
            vmem_limit_bytes=vmem_limit,
        ),
        cost_estimate=cost,
    )(x3d, w3d, b3d)

    return out3d.reshape(N, C, H, W)


def layernorm2d_ref(x, weight, bias, eps=1e-5):
    mean = jnp.mean(x, axis=1, keepdims=True)
    var = jnp.mean((x - mean) ** 2, axis=1, keepdims=True)
    y = (x - mean) / jnp.sqrt(var + eps)
    return y * weight.reshape(1, -1, 1, 1) + bias.reshape(1, -1, 1, 1)


if __name__ == "__main__":
    key = jax.random.PRNGKey(0)
    N, C, H, W = 2, 4, 16, 16

    x = jax.random.normal(key, (N, C, H, W), dtype=jnp.float32)
    # Matches nn.Parameter(torch.ones/zeros(num_features))
    weight = jnp.ones((C,), dtype=jnp.float32)
    bias = jnp.zeros((C,), dtype=jnp.float32)

    out = layernorm2d(x, weight, bias, eps=1e-5)
    out = jax.block_until_ready(out)

    ref = layernorm2d_ref(x, weight, bias, eps=1e-5)
    assert out.shape == (N, C, H, W)
    assert jnp.allclose(out, ref, atol=1e-5, rtol=1e-5)

    print("KERNEL_OK")
</pallas_src>

<mosaic_0001>
module attributes {stable_mosaic.version = 11 : i64} {
  func.func @_layernorm2d_kernel(%arg0: i32, %arg1: i32, %arg2: memref<1x4x256xf32, #tpu.memory_space<vmem>>, %arg3: memref<1x4x1xf32, #tpu.memory_space<vmem>>, %arg4: memref<1x4x1xf32, #tpu.memory_space<vmem>>, %arg5: memref<1x4x256xf32, #tpu.memory_space<vmem>>) attributes {dimension_semantics = [#tpu.dimension_semantics<parallel>, #tpu.dimension_semantics<parallel>], iteration_bounds = array<i64: 2, 1>, scalar_prefetch = 0 : i64, scratch_operands = 0 : i64, tpu.core_type = #tpu.core_type<tc>, window_params = [{transform_indices = @transform_0, window_bounds = array<i64: 1, 4, 256>}, {pipeline_mode = #tpu.pipeline_mode<synchronous>, transform_indices = @transform_1, window_bounds = array<i64: 1, 4, 1>}, {pipeline_mode = #tpu.pipeline_mode<synchronous>, transform_indices = @transform_2, window_bounds = array<i64: 1, 4, 1>}, {transform_indices = @transform_3, window_bounds = array<i64: 1, 4, 256>}]} {
    %c0 = arith.constant 0 : index
    %c0_0 = arith.constant 0 : index
    %c0_1 = arith.constant 0 : index
    %0 = vector.load %arg2[%c0, %c0_0, %c0_1] : memref<1x4x256xf32, #tpu.memory_space<vmem>>, vector<1x4x256xf32>
    %cst = arith.constant dense<0.000000e+00> : vector<1x256xf32>
    %1 = vector.multi_reduction <add>, %0, %cst [1] : vector<1x4x256xf32> to vector<1x256xf32>
    %2 = vector.shape_cast %1 : vector<1x256xf32> to vector<1x1x256xf32>
    %3 = arith.mulf %0, %0 : vector<1x4x256xf32>
    %cst_2 = arith.constant dense<0.000000e+00> : vector<1x256xf32>
    %4 = vector.multi_reduction <add>, %3, %cst_2 [1] : vector<1x4x256xf32> to vector<1x256xf32>
    %5 = vector.shape_cast %4 : vector<1x256xf32> to vector<1x1x256xf32>
    %cst_3 = arith.constant 2.500000e-01 : f32
    %6 = vector.broadcast %cst_3 : f32 to vector<1x1x256xf32>
    %7 = arith.mulf %2, %6 : vector<1x1x256xf32>
    %cst_4 = arith.constant 2.500000e-01 : f32
    %8 = vector.broadcast %cst_4 : f32 to vector<1x1x256xf32>
    %9 = arith.mulf %5, %8 : vector<1x1x256xf32>
    %10 = arith.mulf %7, %7 : vector<1x1x256xf32>
    %11 = arith.subf %9, %10 : vector<1x1x256xf32>
    %cst_5 = arith.constant 0.000000e+00 : f32
    %12 = vector.broadcast %cst_5 : f32 to vector<1x1x256xf32>
    %13 = arith.maximumf %11, %12 : vector<1x1x256xf32>
    %cst_6 = arith.constant 9.99999974E-6 : f32
    %14 = vector.broadcast %cst_6 : f32 to vector<1x1x256xf32>
    %15 = arith.addf %13, %14 : vector<1x1x256xf32>
    %16 = math.rsqrt %15 : vector<1x1x256xf32>
    %c0_7 = arith.constant 0 : index
    %c0_8 = arith.constant 0 : index
    %c0_9 = arith.constant 0 : index
    %17 = vector.load %arg3[%c0_7, %c0_8, %c0_9] : memref<1x4x1xf32, #tpu.memory_space<vmem>>, vector<1x4x1xf32>
    %c0_10 = arith.constant 0 : index
    %c0_11 = arith.constant 0 : index
    %c0_12 = arith.constant 0 : index
    %18 = vector.load %arg4[%c0_10, %c0_11, %c0_12] : memref<1x4x1xf32, #tpu.memory_space<vmem>>, vector<1x4x1xf32>
    %19 = vector.broadcast %7 : vector<1x1x256xf32> to vector<1x4x256xf32>
    %20 = arith.subf %0, %19 : vector<1x4x256xf32>
    %21 = vector.broadcast %16 : vector<1x1x256xf32> to vector<1x4x256xf32>
    %22 = vector.broadcast %17 : vector<1x4x1xf32> to vector<1x4x256xf32>
    %23 = arith.mulf %21, %22 : vector<1x4x256xf32>
    %24 = arith.mulf %20, %23 : vector<1x4x256xf32>
    %25 = vector.broadcast %18 : vector<1x4x1xf32> to vector<1x4x256xf32>
    %26 = arith.addf %24, %25 : vector<1x4x256xf32>
    %c0_13 = arith.constant 0 : index
    %c0_14 = arith.constant 0 : index
    %c0_15 = arith.constant 0 : index
    %27 = vector.load %arg5[%c0_13, %c0_14, %c0_15] : memref<1x4x256xf32, #tpu.memory_space<vmem>>, vector<1x4x256xf32>
    tpu.vector_store %arg5[%c0_13, %c0_14, %c0_15], %26 {strides = array<i32>} : memref<1x4x256xf32, #tpu.memory_space<vmem>>, vector<1x4x256xf32>,
    return
  }
  func.func @transform_0(%arg0: i32, %arg1: i32) -> (i32, i32, i32) {
    %c0_i32 = arith.constant 0 : i32
    %c0_i32_0 = arith.constant 0 : i32
    return %arg0, %c0_i32, %arg1 : i32, i32, i32
  }
  func.func @transform_1(%arg0: i32, %arg1: i32) -> (i32, i32, i32) {
    %c0_i32 = arith.constant 0 : i32
    %c0_i32_0 = arith.constant 0 : i32
    %c0_i32_1 = arith.constant 0 : i32
    %c0_i32_2 = arith.constant 0 : i32
    return %c0_i32, %c0_i32_0, %c0_i32_1 : i32, i32, i32
  }
  func.func @transform_2(%arg0: i32, %arg1: i32) -> (i32, i32, i32) {
    %c0_i32 = arith.constant 0 : i32
    %c0_i32_0 = arith.constant 0 : i32
    %c0_i32_1 = arith.constant 0 : i32
    %c0_i32_2 = arith.constant 0 : i32
    return %c0_i32, %c0_i32_0, %c0_i32_1 : i32, i32, i32
  }
  func.func @transform_3(%arg0: i32, %arg1: i32) -> (i32, i32, i32) {
    %c0_i32 = arith.constant 0 : i32
    %c0_i32_0 = arith.constant 0 : i32
    return %arg0, %c0_i32, %arg1 : i32, i32, i32
  }
}

</mosaic_0001>

<bundles_post_ra>
// kernel: tpu_custom_call.1
= control target key start
LH: loop header
LB: loop body
LE: loop exit
PB: predicated region body
PF: predicated region fallthrough
CT: control target
= control target key end

     0   :  { %8 = vsyncpa [#allocation3], 0  ;;  %s799_s0 = inlined_call_operand.hbm [shape: f32[2,4,256], index: 0, kind: input, shape index: {}]   ;;  %s800_s1 = inlined_call_operand.vmem [shape: f32[1,4,1], index: 1, kind: input, shape index: {}]   ;;  %s801_s2 = inlined_call_operand.vmem [shape: f32[1,4,1], index: 2, kind: input, shape index: {}]   ;;  %s802_s3 = inlined_call_operand.hbm [shape: f32[2,4,256], index: 3, kind: output, shape index: {}]  }
   0x1   :  { %10 = vsyncpa [#allocation3 + $0x1], 0 }
   0x2   :  { %11 = vsyncpa [#allocation4], 0 }
   0x3   :  { %13 = vsyncpa [#allocation4 + $0x1], 0  ;;  %s617_s12 = smov 0   ;;  %s619_s13 = smov 0  }
   0x4   :  { %s621_s14 = smov 0   ;;  %s623_s15 = smov 0  }
   0x5   :  { %s625_s16 = smov 0   ;;  %s627_s17 = smov 0  }
   0x6 LB: > { %s392_s18 = sadd.s32 4294967295, %s591_s17   ;;  %s393_s19 = sadd.s32 4294967294, %s591_s17   ;;  %s591_s17 = sphi %s627_s17, %s19_s17   ;;  %s587_s16 = sphi %s625_s16, %s818_s16   ;;  %s583_s15 = sphi %s623_s15, %s817_s15   ;;  %s579_s14 = sphi %s621_s14, %s816_s14   ;;  %s575_s13 = sphi %s619_s13, %s815_s13   ;;  %s571_s12 = sphi %s617_s12, %s814_s12  }
   0x7   : > { %s31_s20 = sadd.s32 1, %s587_s16  ;;  %s40_s21 = sadd.s32 1, %s579_s14 }
   0x8   : > { %p33_p0 = scmp.ge.s32.totalorder %s31_s20, 2  ;;  %p47_p1 = scmp.ne.s32.totalorder %s579_s14, %s575_s13 }
   0x9   : > { %p48_p2 = scmp.eq.s32.totalorder %s591_s17, 0  ;;  %p53_p3 = scmp.ne.s32.totalorder %s575_s13, %s571_s12 }
   0xa   : > { %s820_s20 = smov (%p33_p0, %s31_s20), 0  ;;  %p54_p5 = scmp.eq.s32.totalorder %s392_s18, 0 }
   0xb   : > { %p658_p4 = por %p48_p2, %p47_p1  ;;  %s35_s23 = ssub.s32 %s587_s16, %s820_s20 }
   0xc   : > { %p121_p6 = scmp.eq.s32.totalorder %s392_s18, 1  ;;  %p38_p7 = scmp.eq.s32.totalorder %s35_s23, 0 }
   0xd   : > { %p664_p8 = por %p54_p5, %p53_p3  ;;  %p127_p10 = scmp.eq.s32.totalorder %s393_s19, 1 }
   0xe   : > { %p668_p9 = por %p121_p6, %p47_p1  ;;  %p421_p13 = scmp.lt.s32.totalorder %s591_s17, 2 }
   0xf   : > { %s673_s26 = scalar_select %p38_p7, %s579_s14, %s40_s21  }
  0x10   : > { %s806_s25 = scalar_select %p668_p9, 1, 0 }
  0x11   : > { %p675_p11 = por %p127_p10, %p53_p3  ;;  %s153_s28 = sand.u32 1, %s579_s14  }
  0x12   : > { %s396_s29 = sshll.u32 %s153_s28, 3  ;;  %s407_s30 = sshll.u32 %s587_s16, 7 }
  0x13   : > { %s807_s27 = scalar_select %p675_p11, 1, 0 }
  0x14   : > { %s686_s6 = scalar_lea.hbm %s799_s0, %s407_s30  ;;  %s157_s7 = scalar_lea.vmem [#allocation2], %s396_s29 }
  0x15   : > { %s167_s8 = sshll.u32 %s157_s7, 4  ;;  %p692_p0 = pnand %p421_p13, %p658_p4  ;;  %s688_s8 = int_to_ptr.vmem [resolvable:$true] %s167_s8 }
  0x16   : > { %s154_s10 = scalar_lea.sflag [#allocation3], %s153_s28  ;;  %s479_s11 = scalar_lea.hbm %s686_s6, 128 }
  0x17   : > { %p480_p3 = scmp.ne.s32.totalorder %s686_s6, %s479_s11  ;;  %p481_p5 = pneg %p692_p0 }
  0x18   : > { %s484_s21 = scalar_lea.hbm %s799_s0, 256  ;;  %p485_p4 = scmp.lt.u32.totalorder %s686_s6, %s799_s0 }
  0x19   : > { %p482_p6 = pnand %p481_p5, %p480_p3  ;;  %p486_p10 = scmp.lt.u32.totalorder %s484_s21, %s479_s11 }
  0x1a   : > { %p488_p12 = scmp.lt.u32.totalorder %s479_s11, %s686_s6 }
  0x1b   : > { %p483_p7 = pneg %p482_p6  ;;  %p487_p13 = por %p486_p10, %p485_p4 }
  0x1d   : > { %p489_p1 = por %p488_p12, %p487_p13 }
  0x1f   : > { %p490_p2 = pnand %p489_p1, %p483_p7 }
  0x21   : > { %493 = shalt.err (!%p490_p2)
}
  0x22   : > { %s494_s28 = scalar_lea.vmem %s688_s8, 128  ;;  %s593_s29 = smov [#allocation2]  }
  0x23   : > { %p495_p3 = scmp.ne.s32.totalorder %s688_s8, %s494_s28  ;;  %s499_s30 = sshll.u32 %s593_s29, 4  ;;  %s500_s30 = int_to_ptr.vmem [resolvable:$false] %s499_s30 }
  0x24   : > { %s501_s4 = scalar_lea.vmem %s500_s30, 256  ;;  %p502_p9 = scmp.lt.s32.totalorder %s688_s8, %s500_s30 }
  0x25   : > { %p497_p6 = pnand %p495_p3, %p481_p5  ;;  %p503_p4 = scmp.lt.s32.totalorder %s501_s4, %s494_s28 }
  0x27   : > { %p498_p11 = pneg %p497_p6  ;;  %p504_p10 = por %p503_p4, %p502_p9 }
  0x29   : > { %p505_p12 = pnand %p504_p10, %p498_p11 }
  0x2b   : > { %508 = shalt.err (!%p505_p12)
}
  0x2c   : > { %416 = dma.hbm_to_vmem [thread:$0]  (!%p692_p0), %s686_s6, 128, %s688_s8, %s154_s10  }
  0x2d   : > { %p809_p1 = scmp.lt.s32.totalorder %s591_s17, 3  ;;  %p810_p2 = scmp.ge.s32.totalorder %s591_s17, 1 }
  0x2f   : > { %p173_p5 = pnand %p810_p2, %p809_p1 }
  0x30   : > { %s728_s5 = sand.u32 (!%p173_p5), 1, %s575_s13  }
  0x31   : > { %176 = sbr.rel (%p173_p5) target bundleno = 209 (0xd1), region = 32  ;;  %s400_s7 = sshll.u32 (!%p173_p5), %s728_s5, 3 }
  0x32   : > { %s179_s11 = scalar_lea.sflag (!%p173_p5), [#allocation3], %s728_s5  ;;  %s182_s9 = scalar_lea.vmem (!%p173_p5), [#allocation2], %s400_s7 }
  0x38   : > { %562 = dma.done.wait (%p664_p8), %s179_s11, 128  }
  0x39   : > { %564 = vsyncadd (%p664_p8), %s179_s11, 4294967168  ;;  %v594_v0 = vmov 0   ;;  %v258_v1 = vld [vmem:[%s800_s1] sm:$0xf]  ;;  %vm211_vm0 = vcmask 1043456   ;;  %v284_v49 = vlaneseq  ;;  %s408_s24 = sshll.u32 %s583_s15, 7 }
  0x3a   : > { %473 = vset.pattern.permute.xlu0 %v594_v0  ;;  %v259_v2 = vld [vmem:[%s801_s2] sm:$0xf]  ;;  %v595_v47 = vmov 839922192   ;;  %s204_s19 = scalar_lea.vmem [#allocation5], %s400_s7  ;;  %s750_s28 = scalar_lea.hbm %s802_s3, %s408_s24 }
  0x3b   : > { %267 = vperm.xlu0 %473, %v258_v1   ;;  %v207_v3 = vld [vmem:[%s182_s9] sm:$0xff]  ;;  %v282_v48 = vunpack.c.l.s4 %v595_v47  ;;  %v285_v52 = vshrl.u32 %v284_v49, 7  ;;  %s308_s21 = sshll.u32 %s204_s19, 4  ;;  %s292_s29 = scalar_lea.sflag [#allocation4], %s728_s5  ;;  %s752_s21 = int_to_ptr.vmem [resolvable:$true] %s308_s21 }
  0x3c   : > { %v209_v4 = vcombine.high %v207_v3, %v207_v3  ;;  %v226_v5 = vmul.f32 %v207_v3, %v207_v3  ;;  %v212_v6 = vsel %vm211_vm0, %v207_v3, 0.0  ;;  %s509_s30 = scalar_lea.vmem %s752_s21, 128  ;;  %p811_p9 = scmp.ne.s32.totalorder %s806_s25, 0 }
  0x3d   : > { %v213_v9 = vrot.slane %v212_v6, 4  ;;  %v283_v51 = vunpack.c.0.s8 %v282_v48  ;;  %p510_p8 = scmp.ne.s32.totalorder %s752_s21, %s509_s30  ;;  %s596_s15 = smov [#allocation5]  }
  0x3e   : > { %v219_v7 = vsel %vm211_vm0, %v209_v4, 0.0  ;;  %v228_v8 = vcombine.high %v226_v5, %v226_v5  ;;  %v230_v11 = vsel %vm211_vm0, %v226_v5, 0.0  ;;  %s513_s4 = sshll.u32 %s596_s15, 4  ;;  %s514_s4 = int_to_ptr.vmem [resolvable:$false] %s513_s4 }
  0x3f   : > { %279 = vperm.xlu0 %473, %v259_v2   ;;  %v220_v10 = vrot.slane %v219_v7, 4  ;;  %v214_v13 = vadd.f32 %v213_v9, %v212_v6  ;;  %v231_v14 = vrot.slane %v230_v11, 4  ;;  %v286_v58 = vsub.s32 %v283_v51, %v285_v52  ;;  %p511_p11 = pnand %p510_p8, %p811_p9  ;;  %s515_s7 = scalar_lea.vmem %s514_s4, 256 }
  0x40   : > { %v237_v12 = vsel %vm211_vm0, %v228_v8, 0.0  ;;  %p516_p7 = scmp.lt.s32.totalorder %s752_s21, %s514_s4  ;;  %p517_p13 = scmp.lt.s32.totalorder %s515_s7, %s509_s30 }
  0x41   : > { %v221_v15 = vadd.f32 %v220_v10, %v219_v7  ;;  %v238_v16 = vrot.slane %v237_v12, 4  ;;  %v215_v17 = vrot.slane %v214_v13, 2  ;;  %v232_v18 = vadd.f32 %v231_v14, %v230_v11  ;;  %p512_p0 = pneg %p511_p11 }
  0x42   : > { %p518_p3 = por %p517_p13, %p516_p7 }
  0x43   : > { %v222_v19 = vrot.slane %v221_v15, 2  ;;  %v239_v20 = vadd.f32 %v238_v16, %v237_v12  ;;  %v216_v21 = vadd.f32 %v215_v17, %v214_v13  ;;  %v233_v22 = vrot.slane %v232_v18, 2 }
  0x44   : > { %p519_p6 = pnand %p518_p3, %p512_p0 }
  0x45   : > { %v223_v23 = vadd.f32 %v222_v19, %v221_v15  ;;  %v240_v24 = vrot.slane %v239_v20, 2  ;;  %v217_v25 = vrot.slane %v216_v21, 1  ;;  %v234_v26 = vadd.f32 %v233_v22, %v232_v18 }
  0x47   : > { %v224_v27 = vrot.slane %v223_v23, 1  ;;  %v241_v28 = vadd.f32 %v240_v24, %v239_v20  ;;  %v218_v29 = vadd.f32 %v217_v25, %v216_v21  ;;  %v235_v30 = vrot.slane %v234_v26, 1 }
  0x49   : > { %v225_v31 = vadd.f32 %v224_v27, %v223_v23  ;;  %v242_v32 = vrot.slane %v241_v28, 1  ;;  %v236_v33 = vadd.f32 %v235_v30, %v234_v26  ;;  %v244_v34 = vmul.f32 0.25, %v218_v29 }
  0x4b   : > { %v243_v35 = vadd.f32 %v242_v32, %v241_v28  ;;  %v245_v36 = vmul.f32 0.25, %v225_v31  ;;  %v246_v37 = vmul.f32 0.25, %v236_v33  ;;  %v248_v38 = vmul.f32 %v244_v34, %v244_v34 }
  0x4d   : > { %v247_v39 = vmul.f32 0.25, %v243_v35  ;;  %v249_v40 = vmul.f32 %v245_v36, %v245_v36  ;;  %v250_v41 = vsub.f32 %v246_v37, %v248_v38  ;;  %v262_v53 = vcombine.low %v244_v34, %v245_v36 }
  0x4f   : > { %v251_v42 = vsub.f32 %v247_v39, %v249_v40  ;;  %v252_v43 = vmax.f32 %v250_v41, 0.0  ;;  %v264_v59 = vsub.f32 %v207_v3, %v262_v53 }
  0x51   : > { %v253_v44 = vmax.f32 %v251_v42, 0.0  ;;  %v254_v45 = vadd.f32 1e-05, %v252_v43 }
  0x53   : > { %v255_v46 = vadd.f32 1e-05, %v253_v44  ;;  %475 = vrsqrt.f32 %v254_v45 }
  0x55   : > { %477 = vrsqrt.f32 %v255_v46 }
  0x5d   : > { %v476_v50 = vpop.eup %475 }
  0x5f   : > { %v478_v54 = vpop.eup %477 }
  0xba   : > { %v268_v55 = vpop.permute.xlu0 %267 }
  0xbb   : > { %v270_v56 = vmul.f32 %v476_v50, %v268_v55  ;;  %v271_v57 = vmul.f32 %v478_v54, %v268_v55 }
  0xbd   : > { %v274_v60 = vcombine.low %v270_v56, %v271_v57 }
  0xbe   : > { %v280_v61 = vpop.permute.xlu0 %279 }
  0xbf   : > { %v276_v62 = vmul.f32 %v274_v60, %v264_v59  ;;  %v287_v63 = vrot.slane %v280_v61, %v286_v58 }
  0xc1   : > { %v289_v0 = vadd.f32 %v287_v63, %v276_v62 }
  0xc3   : > { %290 = vst [vmem:[%s204_s19] sm:$0xff] %v289_v0 }
  0xc4   : > { %522 = shalt.err (!%p519_p6)
}
  0xc5   : > { %s523_s5 = scalar_lea.hbm %s750_s28, 128  ;;  %s527_s6 = scalar_lea.hbm %s802_s3, 256 }
  0xc6   : > { %p524_p4 = scmp.ne.s32.totalorder %s750_s28, %s523_s5  ;;  %p528_p1 = scmp.lt.u32.totalorder %s750_s28, %s802_s3 }
  0xc7   : > { %p529_p2 = scmp.lt.u32.totalorder %s527_s6, %s523_s5  ;;  %p531_p8 = scmp.lt.u32.totalorder %s523_s5, %s750_s28 }
  0xc8   : > { %p525_p10 = pnand %p524_p4, %p811_p9 }
  0xc9   : > { %p530_p5 = por %p529_p2, %p528_p1 }
  0xca   : > { %p526_p12 = pneg %p525_p10 }
  0xcb   : > { %p532_p11 = por %p531_p8, %p530_p5 }
  0xcd   : > { %p533_p0 = pnand %p532_p11, %p526_p12 }
  0xcf   : > { %536 = shalt.err (!%p533_p0)
}
  0xd0   : > { %411 = dma.vmem_to_hbm [thread:$0]  (%p811_p9), %s752_s21, 128, %s750_s28, %s292_s29  }
  0xd1 PF: > { %s320_s18 = sand.u32 1, %s571_s12   ;;  %p812_p7 = scmp.ne.s32.totalorder %s807_s27, 0 }
  0xd2   : > { %p813_p13 = scmp.ge.s32.totalorder %s591_s17, 2  ;;  %s321_s24 = scalar_lea.sflag [#allocation4], %s320_s18 }
  0xd4   : > { %p418_p3 = pnand %p813_p13, %p812_p7 }
  0xd6   : > { %566 = dma.done.wait (!%p418_p3), %s321_s24, 128  }
  0xd7   : > { %568 = vsyncadd (!%p418_p3), %s321_s24, 4294967168  ;;  %s19_s17 = sadd.s32 1, %s591_s17   ;;  %s814_s12 = smov %s575_s13 }
  0xd8   : > { %p16_p6 = scmp.ge.s32.totalorder %s19_s17, 4   ;;  %s815_s13 = smov %s579_s14 }
  0xd9   : > { %s816_s14 = smov %s673_s26  ;;  %s817_s15 = smov %s587_s16 }
  0xda   : > { %s818_s16 = smov %s820_s20  ;;  %18 = sbr.rel (!%p16_p6) target bundleno = 6 (0x6), region = 77 }
  0xe1   :  { %326 = vsyncpa [#allocation3], 1 }
  0xe2   :  { %328 = vsyncpa [#allocation3 + $0x1], 1 }
  0xe3   :  { %329 = vsyncpa [#allocation4], 1 }
  0xe4   :  { %331 = vsyncpa [#allocation4 + $0x1], 1 }

</bundles_post_ra>
